<compile_context>
chip_gen: v5e
topology: v5e:2x2
jax: 0.10.0
libtpu: 0.0.40
codegen_flags: <defaults>
</compile_context>

<pallas_src>
from functools import partial

import jax
import jax.numpy as jnp
from jax.experimental import pallas as pl
from jax.experimental.pallas import tpu as pltpu

IN, H1, H2, D_OUT = 8, 6, 4, 1
LANE = 128
STRIP = 128          # in-kernel compute strip (one vreg-column of lanes)
MAX_TB = 32768       # lanes moved per grid step (~1.1 MiB of x per step)

# Packed-parameter column layout inside the single (8, 128) tile:
#   w1: cols 0:8   (rows 0:6)   b1: col 8   (rows 0:6)
#   w2: cols 9:15  (rows 0:4)   b2: col 15  (rows 0:4)
#   w3: cols 16:20 (row 0)      b3: col 20  (row 0)


def _round_up(n, m):
    return ((n + m - 1) // m) * m


def _choose_tile(batch):
    """Pick (TB, padded_batch) so per-step bytes are large and grid >= 2 when possible."""
    bp = _round_up(max(batch, 1), LANE)
    if bp >= 2 * LANE:
        # Keep at least 2 grid tiles so ("parallel",) can shard across v7x's
        # two TensorCores; still capped at MAX_TB for VMEM friendliness.
        tb = min(MAX_TB, _round_up(-(-bp // 2), LANE))
    else:
        tb = bp
    bp = _round_up(bp, tb)
    return tb, bp


def mlp_kernel(p_ref, xt_ref, o_ref, *, n_strips):
    # p_ref : (8, 128)  packed params (one f32 vreg tile, VMEM-resident)
    # xt_ref: (IN, TB)  x^T tile, batch on the lane axis
    # o_ref : (1, TB)   lane-dense output tile
    p = p_ref[...]

    # Hoisted once per grid step: lane-broadcast weight columns and biases.
    # All per-strip work below is then plain VALU MACs + sublane broadcasts.
    w1 = [jnp.broadcast_to(p[0:H1, k:k + 1], (H1, STRIP)) for k in range(IN)]
    b1 = jnp.broadcast_to(p[0:H1, IN:IN + 1], (H1, STRIP))
    w2 = [jnp.broadcast_to(p[0:H2, 9 + k:10 + k], (H2, STRIP)) for k in range(H1)]
    b2 = jnp.broadcast_to(p[0:H2, 15:16], (H2, STRIP))
    w3 = [jnp.broadcast_to(p[0:D_OUT, 16 + k:17 + k], (D_OUT, STRIP)) for k in range(H2)]
    b3 = jnp.broadcast_to(p[0:D_OUT, 20:21], (D_OUT, STRIP))

    def sigmoid(a):
        # tanh-form sigmoid: 1 EUP push + 2 VALU ops (vs exp + add + divide).
        return 0.5 * jnp.tanh(0.5 * a) + 0.5

    def layer(h, wcols, bias_b):
        # h: (K, STRIP); wcols[k]: (N, STRIP); bias_b: (N, STRIP)
        acc = bias_b                                   # bias folded into acc init
        for k, wk in enumerate(wcols):
            acc = acc + wk * h[k:k + 1, :]             # sublane-broadcast MAC
        return sigmoid(acc)

    def body(s, carry):
        start = pl.multiple_of(s * STRIP, STRIP)
        xs = xt_ref[:, pl.ds(start, STRIP)]            # (8, 128) strip, vreg-resident
        h = layer(xs, w1, b1)                          # (6, 128)
        h = layer(h, w2, b2)                           # (4, 128)
        o_ref[:, pl.ds(start, STRIP)] = layer(h, w3, b3)   # (1, 128) lane-dense store
        return carry

    jax.lax.fori_loop(0, n_strips, body, 0, unroll=min(4, n_strips))


def mlp_forward_xt(xt, packed_params):
    """Preferred entry: x already in (feature, batch) layout -> no HBM transpose."""
    in_dim, batch = xt.shape
    assert in_dim == IN
    tb, bp = _choose_tile(batch)

    xt = xt.astype(jnp.float32)
    if bp != batch:
        xt = jnp.pad(xt, ((0, 0), (0, bp - batch)))

    out_t = pl.pallas_call(
        partial(mlp_kernel, n_strips=tb // STRIP),
        out_shape=jax.ShapeDtypeStruct((1, bp), jnp.float32),
        grid=(bp // tb,),
        in_specs=[
            pl.BlockSpec((8, 128), lambda i: (0, 0)),    # packed params, VMEM-resident
            pl.BlockSpec((IN, tb), lambda i: (0, i)),    # x^T batch tile
        ],
        out_specs=pl.BlockSpec((1, tb), lambda i: (0, i)),
        compiler_params=pltpu.CompilerParams(
            dimension_semantics=("parallel",)),
    )(packed_params, xt)

    return out_t[:, :batch]                              # (1, batch)


def mlp_forward(x, packed_params):
    """PyTorch-layout (batch, in_features) entry, matching Model.forward."""
    # TODO(synk): fuse this transpose into the upstream producer of x so the
    # bandwidth-limited kernel reads x exactly once (use mlp_forward_xt).
    out_t = mlp_forward_xt(x.astype(jnp.float32).T, packed_params)
    return out_t.T                                       # (batch, 1)


def init_params(key):
    # PyTorch nn.Linear default init: U(-1/sqrt(fan_in), 1/sqrt(fan_in)),
    # weights stored in PyTorch [out, in] layout.
    def linear(k, fan_in, fan_out):
        kw, kb = jax.random.split(k)
        bound = 1.0 / (fan_in ** 0.5)
        w = jax.random.uniform(kw, (fan_out, fan_in), jnp.float32, -bound, bound)
        b = jax.random.uniform(kb, (fan_out,), jnp.float32, -bound, bound)
        return w, b

    k1, k2, k3 = jax.random.split(key, 3)
    w1, b1 = linear(k1, IN, H1)
    w2, b2 = linear(k2, H1, H2)
    w3, b3 = linear(k3, H2, D_OUT)
    return w1, b1, w2, b2, w3, b3


def pack_params(params):
    w1, b1, w2, b2, w3, b3 = params
    p = jnp.zeros((8, 128), jnp.float32)
    p = p.at[0:H1, 0:IN].set(w1)
    p = p.at[0:H1, IN].set(b1)
    p = p.at[0:H2, 9:15].set(w2)
    p = p.at[0:H2, 15].set(b2)
    p = p.at[0:D_OUT, 16:20].set(w3)
    p = p.at[0, 20].set(b3[0])
    return p


def reference_forward(x, params):
    w1, b1, w2, b2, w3, b3 = params
    h = jax.nn.sigmoid(x @ w1.T + b1)
    h = jax.nn.sigmoid(h @ w2.T + b2)
    h = jax.nn.sigmoid(h @ w3.T + b3)
    return h


if __name__ == "__main__":
    key = jax.random.PRNGKey(0)
    kx, kp = jax.random.split(key)

    params = init_params(kp)
    packed = pack_params(params)

    # Small PyTorch-shaped smoke test (batch=8, in_features=8): single tile.
    x = jax.random.normal(kx, (8, IN), dtype=jnp.float32)
    out = jax.block_until_ready(mlp_forward(x, packed))
    ref = reference_forward(x, params)
    assert out.shape == (8, 1)
    # tanh-form sigmoid on the EUP vs exp-form reference: allow a few ULP.
    assert jnp.allclose(out, ref, atol=1e-4, rtol=1e-4)

    # Second check: exercises a 2-tile grid, padded lanes, and the in-kernel
    # strip loop (batch=300 -> 2 tiles of 256 lanes, 2 strips each).
    x2 = jax.random.normal(jax.random.PRNGKey(1), (300, IN), dtype=jnp.float32)
    out2 = jax.block_until_ready(mlp_forward(x2, packed))
    ref2 = reference_forward(x2, params)
    assert out2.shape == (300, 1)
    assert jnp.allclose(out2, ref2, atol=1e-4, rtol=1e-4)

    print("KERNEL_OK")
</pallas_src>

<mosaic_0001>
module attributes {stable_mosaic.version = 11 : i64} {
  func.func @mlp_kernel(%arg0: i32, %arg1: memref<8x128xf32, #tpu.memory_space<vmem>>, %arg2: memref<8x128xf32, #tpu.memory_space<vmem>>, %arg3: memref<1x128xf32, #tpu.memory_space<vmem>>) attributes {dimension_semantics = [#tpu.dimension_semantics<parallel>], iteration_bounds = array<i64: 1>, scalar_prefetch = 0 : i64, scratch_operands = 0 : i64, tpu.core_type = #tpu.core_type<tc>, window_params = [{pipeline_mode = #tpu.pipeline_mode<synchronous>, transform_indices = @transform_0, window_bounds = array<i64: 8, 128>}, {transform_indices = @transform_1, window_bounds = array<i64: 8, 128>}, {transform_indices = @transform_2, window_bounds = array<i64: 1, 128>}]} {
    %c0 = arith.constant 0 : index
    %c0_0 = arith.constant 0 : index
    %0 = vector.load %arg1[%c0, %c0_0] : memref<8x128xf32, #tpu.memory_space<vmem>>, vector<8x128xf32>
    %1 = vector.extract_strided_slice %0 {offsets = [0, 0], sizes = [6, 1], strides = [1, 1]} : vector<8x128xf32> to vector<6x1xf32>
    %2 = vector.shape_cast %1 : vector<6x1xf32> to vector<6x1xf32>
    %3 = vector.broadcast %2 : vector<6x1xf32> to vector<6x128xf32>
    %4 = vector.extract_strided_slice %0 {offsets = [0, 1], sizes = [6, 1], strides = [1, 1]} : vector<8x128xf32> to vector<6x1xf32>
    %5 = vector.shape_cast %4 : vector<6x1xf32> to vector<6x1xf32>
    %6 = vector.broadcast %5 : vector<6x1xf32> to vector<6x128xf32>
    %7 = vector.extract_strided_slice %0 {offsets = [0, 2], sizes = [6, 1], strides = [1, 1]} : vector<8x128xf32> to vector<6x1xf32>
    %8 = vector.shape_cast %7 : vector<6x1xf32> to vector<6x1xf32>
    %9 = vector.broadcast %8 : vector<6x1xf32> to vector<6x128xf32>
    %10 = vector.extract_strided_slice %0 {offsets = [0, 3], sizes = [6, 1], strides = [1, 1]} : vector<8x128xf32> to vector<6x1xf32>
    %11 = vector.shape_cast %10 : vector<6x1xf32> to vector<6x1xf32>
    %12 = vector.broadcast %11 : vector<6x1xf32> to vector<6x128xf32>
    %13 = vector.extract_strided_slice %0 {offsets = [0, 4], sizes = [6, 1], strides = [1, 1]} : vector<8x128xf32> to vector<6x1xf32>
    %14 = vector.shape_cast %13 : vector<6x1xf32> to vector<6x1xf32>
    %15 = vector.broadcast %14 : vector<6x1xf32> to vector<6x128xf32>
    %16 = vector.extract_strided_slice %0 {offsets = [0, 5], sizes = [6, 1], strides = [1, 1]} : vector<8x128xf32> to vector<6x1xf32>
    %17 = vector.shape_cast %16 : vector<6x1xf32> to vector<6x1xf32>
    %18 = vector.broadcast %17 : vector<6x1xf32> to vector<6x128xf32>
    %19 = vector.extract_strided_slice %0 {offsets = [0, 6], sizes = [6, 1], strides = [1, 1]} : vector<8x128xf32> to vector<6x1xf32>
    %20 = vector.shape_cast %19 : vector<6x1xf32> to vector<6x1xf32>
    %21 = vector.broadcast %20 : vector<6x1xf32> to vector<6x128xf32>
    %22 = vector.extract_strided_slice %0 {offsets = [0, 7], sizes = [6, 1], strides = [1, 1]} : vector<8x128xf32> to vector<6x1xf32>
    %23 = vector.shape_cast %22 : vector<6x1xf32> to vector<6x1xf32>
    %24 = vector.broadcast %23 : vector<6x1xf32> to vector<6x128xf32>
    %25 = vector.extract_strided_slice %0 {offsets = [0, 8], sizes = [6, 1], strides = [1, 1]} : vector<8x128xf32> to vector<6x1xf32>
    %26 = vector.shape_cast %25 : vector<6x1xf32> to vector<6x1xf32>
    %27 = vector.broadcast %26 : vector<6x1xf32> to vector<6x128xf32>
    %28 = vector.extract_strided_slice %0 {offsets = [0, 9], sizes = [4, 1], strides = [1, 1]} : vector<8x128xf32> to vector<4x1xf32>
    %29 = vector.shape_cast %28 : vector<4x1xf32> to vector<4x1xf32>
    %30 = vector.broadcast %29 : vector<4x1xf32> to vector<4x128xf32>
    %31 = vector.extract_strided_slice %0 {offsets = [0, 10], sizes = [4, 1], strides = [1, 1]} : vector<8x128xf32> to vector<4x1xf32>
    %32 = vector.shape_cast %31 : vector<4x1xf32> to vector<4x1xf32>
    %33 = vector.broadcast %32 : vector<4x1xf32> to vector<4x128xf32>
    %34 = vector.extract_strided_slice %0 {offsets = [0, 11], sizes = [4, 1], strides = [1, 1]} : vector<8x128xf32> to vector<4x1xf32>
    %35 = vector.shape_cast %34 : vector<4x1xf32> to vector<4x1xf32>
    %36 = vector.broadcast %35 : vector<4x1xf32> to vector<4x128xf32>
    %37 = vector.extract_strided_slice %0 {offsets = [0, 12], sizes = [4, 1], strides = [1, 1]} : vector<8x128xf32> to vector<4x1xf32>
    %38 = vector.shape_cast %37 : vector<4x1xf32> to vector<4x1xf32>
    %39 = vector.broadcast %38 : vector<4x1xf32> to vector<4x128xf32>
    %40 = vector.extract_strided_slice %0 {offsets = [0, 13], sizes = [4, 1], strides = [1, 1]} : vector<8x128xf32> to vector<4x1xf32>
    %41 = vector.shape_cast %40 : vector<4x1xf32> to vector<4x1xf32>
    %42 = vector.broadcast %41 : vector<4x1xf32> to vector<4x128xf32>
    %43 = vector.extract_strided_slice %0 {offsets = [0, 14], sizes = [4, 1], strides = [1, 1]} : vector<8x128xf32> to vector<4x1xf32>
    %44 = vector.shape_cast %43 : vector<4x1xf32> to vector<4x1xf32>
    %45 = vector.broadcast %44 : vector<4x1xf32> to vector<4x128xf32>
    %46 = vector.extract_strided_slice %0 {offsets = [0, 15], sizes = [4, 1], strides = [1, 1]} : vector<8x128xf32> to vector<4x1xf32>
    %47 = vector.shape_cast %46 : vector<4x1xf32> to vector<4x1xf32>
    %48 = vector.broadcast %47 : vector<4x1xf32> to vector<4x128xf32>
    %49 = vector.extract_strided_slice %0 {offsets = [0, 16], sizes = [1, 1], strides = [1, 1]} : vector<8x128xf32> to vector<1x1xf32>
    %50 = vector.shape_cast %49 : vector<1x1xf32> to vector<1x1xf32>
    %51 = vector.broadcast %50 : vector<1x1xf32> to vector<1x128xf32>
    %52 = vector.extract_strided_slice %0 {offsets = [0, 17], sizes = [1, 1], strides = [1, 1]} : vector<8x128xf32> to vector<1x1xf32>
    %53 = vector.shape_cast %52 : vector<1x1xf32> to vector<1x1xf32>
    %54 = vector.broadcast %53 : vector<1x1xf32> to vector<1x128xf32>
    %55 = vector.extract_strided_slice %0 {offsets = [0, 18], sizes = [1, 1], strides = [1, 1]} : vector<8x128xf32> to vector<1x1xf32>
    %56 = vector.shape_cast %55 : vector<1x1xf32> to vector<1x1xf32>
    %57 = vector.broadcast %56 : vector<1x1xf32> to vector<1x128xf32>
    %58 = vector.extract_strided_slice %0 {offsets = [0, 19], sizes = [1, 1], strides = [1, 1]} : vector<8x128xf32> to vector<1x1xf32>
    %59 = vector.shape_cast %58 : vector<1x1xf32> to vector<1x1xf32>
    %60 = vector.broadcast %59 : vector<1x1xf32> to vector<1x128xf32>
    %61 = vector.extract_strided_slice %0 {offsets = [0, 20], sizes = [1, 1], strides = [1, 1]} : vector<8x128xf32> to vector<1x1xf32>
    %62 = vector.shape_cast %61 : vector<1x1xf32> to vector<1x1xf32>
    %63 = vector.broadcast %62 : vector<1x1xf32> to vector<1x128xf32>
    %c0_i32 = arith.constant 0 : i32
    %c128_i32 = arith.constant 128 : i32
    %64 = arith.muli %c0_i32, %c128_i32 : i32
    %65 = tpu.assume_multiple %64, 128 : i32
    %c0_1 = arith.constant 0 : index
    %66 = arith.index_cast %65 : i32 to index
    %67 = vector.load %arg2[%c0_1, %66] : memref<8x128xf32, #tpu.memory_space<vmem>>, vector<8x128xf32>
    %68 = vector.extract_strided_slice %67 {offsets = [0, 0], sizes = [1, 128], strides = [1, 1]} : vector<8x128xf32> to vector<1x128xf32>
    %69 = vector.broadcast %68 : vector<1x128xf32> to vector<6x128xf32>
    %70 = arith.mulf %3, %69 : vector<6x128xf32>
    %71 = arith.addf %27, %70 : vector<6x128xf32>
    %72 = vector.extract_strided_slice %67 {offsets = [1, 0], sizes = [1, 128], strides = [1, 1]} : vector<8x128xf32> to vector<1x128xf32>
    %73 = vector.broadcast %72 : vector<1x128xf32> to vector<6x128xf32>
    %74 = arith.mulf %6, %73 : vector<6x128xf32>
    %75 = arith.addf %71, %74 : vector<6x128xf32>
    %76 = vector.extract_strided_slice %67 {offsets = [2, 0], sizes = [1, 128], strides = [1, 1]} : vector<8x128xf32> to vector<1x128xf32>
    %77 = vector.broadcast %76 : vector<1x128xf32> to vector<6x128xf32>
    %78 = arith.mulf %9, %77 : vector<6x128xf32>
    %79 = arith.addf %75, %78 : vector<6x128xf32>
    %80 = vector.extract_strided_slice %67 {offsets = [3, 0], sizes = [1, 128], strides = [1, 1]} : vector<8x128xf32> to vector<1x128xf32>
    %81 = vector.broadcast %80 : vector<1x128xf32> to vector<6x128xf32>
    %82 = arith.mulf %12, %81 : vector<6x128xf32>
    %83 = arith.addf %79, %82 : vector<6x128xf32>
    %84 = vector.extract_strided_slice %67 {offsets = [4, 0], sizes = [1, 128], strides = [1, 1]} : vector<8x128xf32> to vector<1x128xf32>
    %85 = vector.broadcast %84 : vector<1x128xf32> to vector<6x128xf32>
    %86 = arith.mulf %15, %85 : vector<6x128xf32>
    %87 = arith.addf %83, %86 : vector<6x128xf32>
    %88 = vector.extract_strided_slice %67 {offsets = [5, 0], sizes = [1, 128], strides = [1, 1]} : vector<8x128xf32> to vector<1x128xf32>
    %89 = vector.broadcast %88 : vector<1x128xf32> to vector<6x128xf32>
    %90 = arith.mulf %18, %89 : vector<6x128xf32>
    %91 = arith.addf %87, %90 : vector<6x128xf32>
    %92 = vector.extract_strided_slice %67 {offsets = [6, 0], sizes = [1, 128], strides = [1, 1]} : vector<8x128xf32> to vector<1x128xf32>
    %93 = vector.broadcast %92 : vector<1x128xf32> to vector<6x128xf32>
    %94 = arith.mulf %21, %93 : vector<6x128xf32>
    %95 = arith.addf %91, %94 : vector<6x128xf32>
    %96 = vector.extract_strided_slice %67 {offsets = [7, 0], sizes = [1, 128], strides = [1, 1]} : vector<8x128xf32> to vector<1x128xf32>
    %97 = vector.broadcast %96 : vector<1x128xf32> to vector<6x128xf32>
    %98 = arith.mulf %24, %97 : vector<6x128xf32>
    %99 = arith.addf %95, %98 : vector<6x128xf32>
    %cst = arith.constant 5.000000e-01 : f32
    %100 = vector.broadcast %cst : f32 to vector<6x128xf32>
    %101 = arith.mulf %100, %99 : vector<6x128xf32>
    %102 = math.tanh %101 : vector<6x128xf32>
    %cst_2 = arith.constant 5.000000e-01 : f32
    %103 = vector.broadcast %cst_2 : f32 to vector<6x128xf32>
    %104 = arith.mulf %103, %102 : vector<6x128xf32>
    %cst_3 = arith.constant 5.000000e-01 : f32
    %105 = vector.broadcast %cst_3 : f32 to vector<6x128xf32>
    %106 = arith.addf %104, %105 : vector<6x128xf32>
    %107 = vector.extract_strided_slice %106 {offsets = [0, 0], sizes = [1, 128], strides = [1, 1]} : vector<6x128xf32> to vector<1x128xf32>
    %108 = vector.broadcast %107 : vector<1x128xf32> to vector<4x128xf32>
    %109 = arith.mulf %30, %108 : vector<4x128xf32>
    %110 = arith.addf %48, %109 : vector<4x128xf32>
    %111 = vector.extract_strided_slice %106 {offsets = [1, 0], sizes = [1, 128], strides = [1, 1]} : vector<6x128xf32> to vector<1x128xf32>
    %112 = vector.broadcast %111 : vector<1x128xf32> to vector<4x128xf32>
    %113 = arith.mulf %33, %112 : vector<4x128xf32>
    %114 = arith.addf %110, %113 : vector<4x128xf32>
    %115 = vector.extract_strided_slice %106 {offsets = [2, 0], sizes = [1, 128], strides = [1, 1]} : vector<6x128xf32> to vector<1x128xf32>
    %116 = vector.broadcast %115 : vector<1x128xf32> to vector<4x128xf32>
    %117 = arith.mulf %36, %116 : vector<4x128xf32>
    %118 = arith.addf %114, %117 : vector<4x128xf32>
    %119 = vector.extract_strided_slice %106 {offsets = [3, 0], sizes = [1, 128], strides = [1, 1]} : vector<6x128xf32> to vector<1x128xf32>
    %120 = vector.broadcast %119 : vector<1x128xf32> to vector<4x128xf32>
    %121 = arith.mulf %39, %120 : vector<4x128xf32>
    %122 = arith.addf %118, %121 : vector<4x128xf32>
    %123 = vector.extract_strided_slice %106 {offsets = [4, 0], sizes = [1, 128], strides = [1, 1]} : vector<6x128xf32> to vector<1x128xf32>
    %124 = vector.broadcast %123 : vector<1x128xf32> to vector<4x128xf32>
    %125 = arith.mulf %42, %124 : vector<4x128xf32>
    %126 = arith.addf %122, %125 : vector<4x128xf32>
    %127 = vector.extract_strided_slice %106 {offsets = [5, 0], sizes = [1, 128], strides = [1, 1]} : vector<6x128xf32> to vector<1x128xf32>
    %128 = vector.broadcast %127 : vector<1x128xf32> to vector<4x128xf32>
    %129 = arith.mulf %45, %128 : vector<4x128xf32>
    %130 = arith.addf %126, %129 : vector<4x128xf32>
    %cst_4 = arith.constant 5.000000e-01 : f32
    %131 = vector.broadcast %cst_4 : f32 to vector<4x128xf32>
    %132 = arith.mulf %131, %130 : vector<4x128xf32>
    %133 = math.tanh %132 : vector<4x128xf32>
    %cst_5 = arith.constant 5.000000e-01 : f32
    %134 = vector.broadcast %cst_5 : f32 to vector<4x128xf32>
    %135 = arith.mulf %134, %133 : vector<4x128xf32>
    %cst_6 = arith.constant 5.000000e-01 : f32
    %136 = vector.broadcast %cst_6 : f32 to vector<4x128xf32>
    %137 = arith.addf %135, %136 : vector<4x128xf32>
    %138 = vector.extract_strided_slice %137 {offsets = [0, 0], sizes = [1, 128], strides = [1, 1]} : vector<4x128xf32> to vector<1x128xf32>
    %139 = arith.mulf %51, %138 : vector<1x128xf32>
    %140 = arith.addf %63, %139 : vector<1x128xf32>
    %141 = vector.extract_strided_slice %137 {offsets = [1, 0], sizes = [1, 128], strides = [1, 1]} : vector<4x128xf32> to vector<1x128xf32>
    %142 = arith.mulf %54, %141 : vector<1x128xf32>
    %143 = arith.addf %140, %142 : vector<1x128xf32>
    %144 = vector.extract_strided_slice %137 {offsets = [2, 0], sizes = [1, 128], strides = [1, 1]} : vector<4x128xf32> to vector<1x128xf32>
    %145 = arith.mulf %57, %144 : vector<1x128xf32>
    %146 = arith.addf %143, %145 : vector<1x128xf32>
    %147 = vector.extract_strided_slice %137 {offsets = [3, 0], sizes = [1, 128], strides = [1, 1]} : vector<4x128xf32> to vector<1x128xf32>
    %148 = arith.mulf %60, %147 : vector<1x128xf32>
    %149 = arith.addf %146, %148 : vector<1x128xf32>
    %cst_7 = arith.constant 5.000000e-01 : f32
    %150 = vector.broadcast %cst_7 : f32 to vector<1x128xf32>
    %151 = arith.mulf %150, %149 : vector<1x128xf32>
    %152 = math.tanh %151 : vector<1x128xf32>
    %cst_8 = arith.constant 5.000000e-01 : f32
    %153 = vector.broadcast %cst_8 : f32 to vector<1x128xf32>
    %154 = arith.mulf %153, %152 : vector<1x128xf32>
    %cst_9 = arith.constant 5.000000e-01 : f32
    %155 = vector.broadcast %cst_9 : f32 to vector<1x128xf32>
    %156 = arith.addf %154, %155 : vector<1x128xf32>
    %c0_10 = arith.constant 0 : index
    %157 = arith.index_cast %65 : i32 to index
    %158 = vector.load %arg3[%c0_10, %157] : memref<1x128xf32, #tpu.memory_space<vmem>>, vector<1x128xf32>
    tpu.vector_store %arg3[%c0_10, %157], %156 {strides = array<i32>} : memref<1x128xf32, #tpu.memory_space<vmem>>, vector<1x128xf32>,
    %c1_i32 = arith.constant 1 : i32
    return
  }
  func.func @transform_0(%arg0: i32) -> (i32, i32) {
    %c0_i32 = arith.constant 0 : i32
    %c0_i32_0 = arith.constant 0 : i32
    %c0_i32_1 = arith.constant 0 : i32
    return %c0_i32, %c0_i32_0 : i32, i32
  }
  func.func @transform_1(%arg0: i32) -> (i32, i32) {
    %c0_i32 = arith.constant 0 : i32
    %c0_i32_0 = arith.constant 0 : i32
    return %c0_i32, %arg0 : i32, i32
  }
  func.func @transform_2(%arg0: i32) -> (i32, i32) {
    %c0_i32 = arith.constant 0 : i32
    %c0_i32_0 = arith.constant 0 : i32
    return %c0_i32, %arg0 : i32, i32
  }
}

</mosaic_0001>

<bundles_post_ra>
// kernel: tpu_custom_call.1
= control target key start
LH: loop header
LB: loop body
LE: loop exit
PB: predicated region body
PF: predicated region fallthrough
CT: control target
= control target key end

     0   :  { %7 = vsyncpa [#allocation3], 0  ;;  %s392_s0 = inlined_call_operand.hbm [shape: f32[8,128], index: 0, kind: input, shape index: {}]   ;;  %s393_s1 = inlined_call_operand.hbm [shape: f32[8,128], index: 1, kind: input, shape index: {}]   ;;  %s394_s2 = inlined_call_operand.hbm [shape: f32[1,128], index: 2, kind: output, shape index: {}]  }
   0x1   :  { %8 = vsyncpa [#allocation6], 0 }
   0x2   :  { %9 = vsyncpa [#allocation4], 0  ;;  %s15_s11 = sshll.u32 %s392_s0, 4  ;;  %s344_s12 = smov [#allocation2]   ;;  %s16_s11 = int_to_ptr.hbm [resolvable:$true] %s15_s11 }
   0x3   :  { %s17_s13 = sshll.u32 %s344_s12, 4  ;;  %s26_s16 = sshll.u32 %s393_s1, 4  ;;  %s18_s13 = int_to_ptr.vmem [resolvable:$true] %s17_s13  ;;  %s27_s16 = int_to_ptr.hbm [resolvable:$true] %s26_s16 }
   0x4   :  { %20 = dma.hbm_to_vmem [thread:$0]  %s16_s11, 128, %s18_s13, [#allocation3]  }
   0x5   :  { %s345_s17 = smov [#allocation5]  }
   0x6   :  { %s28_s18 = sshll.u32 %s345_s17, 4  ;;  %s29_s18 = int_to_ptr.vmem [resolvable:$true] %s28_s18 }
   0x7   :  { %31 = dma.hbm_to_vmem [thread:$0]  %s27_s16, 128, %s29_s18, [#allocation6]  }
   0x8   :  { %338 = dma.done.wait [#allocation3], 128  }
   0x9   :  { %339 = vsyncadd [#allocation3], 4294967168 }
   0xa   :  { %340 = dma.done.wait [#allocation6], 128  }
   0xb   :  { %341 = vsyncadd [#allocation6], 4294967168  ;;  %v346_v0 = vmov 8   ;;  %v347_v1 = vmov 0   ;;  %v348_v2 = vmov 3   ;;  %v40_v3 = vld [vmem:[#allocation2] sm:$0xff] }
   0xc   :  { %241 = vset.pattern.permute.xlu1 %v346_v0  ;;  %239 = vset.pattern.permute.xlu0 %v347_v1  ;;  %v349_v4 = vmov 2   ;;  %v350_v5 = vmov 1   ;;  %v351_v6 = vmov 4   ;;  %v352_v7 = vmov 5   ;;  %v126_v23 = vld [vmem:[#allocation5] sm:$0xff]  ;;  %s367_s0 = smov [#allocation7]  }
   0xd   :  { %243 = vset.pattern.permute.xlu2 %v348_v2  ;;  %75 = vperm.xlu1 %241, %v40_v3   ;;  %v353_v8 = vmov 7   ;;  %v354_v9 = vmov 6   ;;  %v355_v10 = vmov 9   ;;  %v356_v11 = vmov 12   ;;  %s202_s1 = sshll.u32 %s367_s0, 4  ;;  %s204_s21 = sshll.u32 %s394_s2, 4  ;;  %s203_s1 = int_to_ptr.vmem [resolvable:$true] %s202_s1  ;;  %s205_s21 = int_to_ptr.hbm [resolvable:$true] %s204_s21 }
   0xe   :  { %43 = vperm.xlu0 %239, %v40_v3   ;;  %55 = vperm.xlu2 %243, %v40_v3   ;;  %v357_v12 = vmov 10   ;;  %v358_v13 = vmov 15   ;;  %v359_v14 = vmov 20   ;;  %v360_v15 = vmov 11  }
   0xf   :  { %v361_v16 = vmov 13   ;;  %v362_v17 = vmov 14   ;;  %v363_v18 = vmov 16   ;;  %v364_v19 = vmov 17  }
  0x10   :  { %v365_v20 = vmov 18   ;;  %v366_v21 = vmov 19   ;;  %v127_v26 = vperm.slane %v126_v23, 0  ;;  %v130_v28 = vperm.slane %v126_v23, 1 }
  0x11   :  { %v133_v30 = vperm.slane %v126_v23, 2  ;;  %v136_v34 = vperm.slane %v126_v23, 3  ;;  %v139_v36 = vperm.slane %v126_v23, 4  ;;  %v145_v41 = vperm.slane %v126_v23, 6 }
  0x12   :  { %v142_v42 = vperm.slane %v126_v23, 5  ;;  %v148_v46 = vperm.slane %v126_v23, 7 }
  0x15   :  { %242 = vset.pattern.permute.xlu1 %v349_v4 }
  0x16   :  { %240 = vset.pattern.permute.xlu0 %v350_v5  ;;  %51 = vperm.xlu1 %242, %v40_v3  }
  0x17   :  { %47 = vperm.xlu0 %240, %v40_v3   ;;  %244 = vset.pattern.permute.xlu2 %v351_v6 }
  0x18   :  { %59 = vperm.xlu2 %244, %v40_v3  }
  0x1e   :  { %245 = vset.pattern.permute.xlu1 %v352_v7 }
  0x1f   :  { %247 = vset.pattern.permute.xlu0 %v353_v8  ;;  %63 = vperm.xlu1 %245, %v40_v3  }
  0x20   :  { %71 = vperm.xlu0 %247, %v40_v3   ;;  %246 = vset.pattern.permute.xlu2 %v354_v9 }
  0x21   :  { %67 = vperm.xlu2 %246, %v40_v3  }
  0x27   :  { %248 = vset.pattern.permute.xlu1 %v355_v10 }
  0x28   :  { %252 = vset.pattern.permute.xlu0 %v356_v11  ;;  %79 = vperm.xlu1 %248, %v40_v3  }
  0x29   :  { %91 = vperm.xlu0 %252, %v40_v3   ;;  %249 = vset.pattern.permute.xlu2 %v357_v12 }
  0x2a   :  { %83 = vperm.xlu2 %249, %v40_v3  }
  0x30   :  { %250 = vset.pattern.permute.xlu1 %v358_v13 }
  0x31   :  { %257 = vset.pattern.permute.xlu0 %v359_v14  ;;  %103 = vperm.xlu1 %250, %v40_v3  }
  0x32   :  { %123 = vperm.xlu0 %257, %v40_v3   ;;  %251 = vset.pattern.permute.xlu2 %v360_v15 }
  0x33   :  { %87 = vperm.xlu2 %251, %v40_v3  }
  0x39   :  { %253 = vset.pattern.permute.xlu1 %v361_v16 }
  0x3a   :  { %95 = vperm.xlu1 %253, %v40_v3  }
  0x3b   :  { %254 = vset.pattern.permute.xlu2 %v362_v17 }
  0x3c   :  { %99 = vperm.xlu2 %254, %v40_v3  }
  0x42   :  { %255 = vset.pattern.permute.xlu1 %v363_v18 }
  0x43   :  { %107 = vperm.xlu1 %255, %v40_v3  }
  0x44   :  { %256 = vset.pattern.permute.xlu2 %v364_v19 }
  0x45   :  { %111 = vperm.xlu2 %256, %v40_v3  }
  0x4b   :  { %258 = vset.pattern.permute.xlu1 %v365_v20 }
  0x4c   :  { %115 = vperm.xlu1 %258, %v40_v3  }
  0x4d   :  { %259 = vset.pattern.permute.xlu2 %v366_v21 }
  0x4e   :  { %119 = vperm.xlu2 %259, %v40_v3  }
  0x68   :  { %v56_v22 = vpop.permute.xlu2 %55 }
  0x69   :  { %v137_v39 = vmul.f32 %v136_v34, %v56_v22 }
  0x72   :  { %v60_v29 = vpop.permute.xlu2 %59 }
  0x73   :  { %v140_v43 = vmul.f32 %v139_v36, %v60_v29 }
  0x7b   :  { %v68_v45 = vpop.permute.xlu2 %67 }
  0x7c   :  { %v146_v50 = vmul.f32 %v145_v41, %v68_v45 }
  0x7f   :  { %v76_v24 = vpop.permute.xlu1 %75 }
  0x80   :  { %v44_v25 = vpop.permute.xlu0 %43 }
  0x81   :  { %v128_v27 = vmul.f32 %v127_v26, %v44_v25 }
  0x83   :  { %v129_v33 = vadd.f32 %v128_v27, %v76_v24 }
  0x84   :  { %v84_v58 = vpop.permute.xlu2 %83 }
  0x88   :  { %v52_v31 = vpop.permute.xlu1 %51 }
  0x89   :  { %v48_v32 = vpop.permute.xlu0 %47  ;;  %v134_v37 = vmul.f32 %v133_v30, %v52_v31 }
  0x8a   :  { %v131_v35 = vmul.f32 %v130_v28, %v48_v32 }
  0x8c   :  { %v132_v38 = vadd.f32 %v131_v35, %v129_v33 }
  0x8d   :  { %v88_v63 = vpop.permute.xlu2 %87 }
  0x8e   :  { %v135_v40 = vadd.f32 %v134_v37, %v132_v38 }
  0x90   :  { %v138_v44 = vadd.f32 %v137_v39, %v135_v40 }
  0x91   :  { %v64_v47 = vpop.permute.xlu1 %63 }
  0x92   :  { %v141_v48 = vadd.f32 %v140_v43, %v138_v44  ;;  %v72_v49 = vpop.permute.xlu0 %71  ;;  %v143_v51 = vmul.f32 %v142_v42, %v64_v47 }
  0x93   :  { %v149_v53 = vmul.f32 %v148_v46, %v72_v49 }
  0x94   :  { %v144_v52 = vadd.f32 %v143_v51, %v141_v48 }
  0x96   :  { %v147_v54 = vadd.f32 %v146_v50, %v144_v52  ;;  %v100_v15 = vpop.permute.xlu2 %99 }
  0x98   :  { %v150_v55 = vadd.f32 %v149_v53, %v147_v54 }
  0x9a   :  { %v151_v56 = vmul.f32 0.5, %v150_v55  ;;  %v80_v57 = vpop.permute.xlu1 %79 }
  0x9b   :  { %v92_v7 = vpop.permute.xlu0 %91 }
  0x9c   :  { %260 = vtanh.f32 %v151_v56 }
  0x9f   :  { %v112_v23 = vpop.permute.xlu2 %111 }
  0xa2   :  { %v261_v59 = vpop.eup %260 }
  0xa3   :  { %v153_v60 = vmul.f32 0.5, %v261_v59  ;;  %v104_v61 = vpop.permute.xlu1 %103 }
  0xa4   :  { %v124_v27 = vpop.permute.xlu0 %123 }
  0xa5   :  { %v154_v62 = vadd.f32 0.5, %v153_v60 }
  0xa7   :  { %v158_v0 = vperm.slane %v154_v62, 1  ;;  %v155_v1 = vperm.slane %v154_v62, 0  ;;  %v161_v3 = vperm.slane %v154_v62, 2  ;;  %v164_v6 = vperm.slane %v154_v62, 3 }
  0xa8   :  { %v170_v11 = vperm.slane %v154_v62, 5  ;;  %v167_v14 = vperm.slane %v154_v62, 4  ;;  %v120_v35 = vpop.permute.xlu2 %119 }
  0xa9   :  { %v156_v2 = vmul.f32 %v155_v1, %v80_v57  ;;  %v159_v4 = vmul.f32 %v158_v0, %v84_v58  ;;  %v162_v8 = vmul.f32 %v161_v3, %v88_v63  ;;  %v165_v13 = vmul.f32 %v164_v6, %v92_v7 }
  0xaa   :  { %v171_v18 = vmul.f32 %v170_v11, %v100_v15 }
  0xab   :  { %v157_v5 = vadd.f32 %v156_v2, %v104_v61 }
  0xac   :  { %v96_v10 = vpop.permute.xlu1 %95 }
  0xad   :  { %v160_v9 = vadd.f32 %v159_v4, %v157_v5  ;;  %v168_v17 = vmul.f32 %v167_v14, %v96_v10 }
  0xaf   :  { %v163_v12 = vadd.f32 %v162_v8, %v160_v9 }
  0xb1   :  { %v166_v16 = vadd.f32 %v165_v13, %v163_v12 }
  0xb3   :  { %v169_v19 = vadd.f32 %v168_v17, %v166_v16 }
  0xb5   :  { %v172_v20 = vadd.f32 %v171_v18, %v169_v19  ;;  %v108_v22 = vpop.permute.xlu1 %107 }
  0xb7   :  { %v173_v21 = vmul.f32 0.5, %v172_v20 }
  0xb9   :  { %262 = vtanh.f32 %v173_v21 }
  0xbe   :  { %v116_v31 = vpop.permute.xlu1 %115 }
  0xbf   :  { %v263_v24 = vpop.eup %262 }
  0xc0   :  { %v175_v25 = vmul.f32 0.5, %v263_v24 }
  0xc2   :  { %v176_v26 = vadd.f32 0.5, %v175_v25 }
  0xc4   :  { %v180_v28 = vrot.slane %v176_v26, 1  ;;  %v177_v29 = vmul.f32 %v176_v26, %v108_v22  ;;  %v184_v30 = vrot.slane %v176_v26, 2  ;;  %v188_v33 = vrot.slane %v176_v26, 3 }
  0xc6   :  { %v182_v32 = vmul.f32 %v180_v28, %v112_v23  ;;  %v178_v34 = vadd.f32 %v177_v29, %v124_v27  ;;  %v186_v36 = vmul.f32 %v184_v30, %v116_v31  ;;  %v190_v38 = vmul.f32 %v188_v33, %v120_v35 }
  0xc8   :  { %v183_v37 = vadd.f32 %v182_v32, %v178_v34 }
  0xca   :  { %v187_v39 = vadd.f32 %v186_v36, %v183_v37 }
  0xcc   :  { %v191_v40 = vadd.f32 %v190_v38, %v187_v39 }
  0xce   :  { %v192_v41 = vmul.f32 0.5, %v191_v40 }
  0xd0   :  { %264 = vtanh.f32 %v192_v41 }
  0xd6   :  { %v265_v42 = vpop.eup %264 }
  0xd7   :  { %v194_v43 = vmul.f32 0.5, %v265_v42 }
  0xd9   :  { %v195_v44 = vadd.f32 0.5, %v194_v43 }
  0xdb   :  { %196 = vst [vmem:[#allocation7] sm:$0x1] %v195_v44 }
  0xdc   :  { %207 = dma.vmem_to_hbm [thread:$0]  %s203_s1, 16, %s205_s21, [#allocation4]  }
  0xdd   :  { %342 = dma.done.wait [#allocation4], 16  }
  0xde   :  { %343 = vsyncadd [#allocation4], 4294967280 }
  0xdf   :  { %212 = vsyncpa [#allocation3], 1 }
  0xe0   :  { %213 = vsyncpa [#allocation6], 1 }
  0xe1   :  { %214 = vsyncpa [#allocation4], 1 }

</bundles_post_ra>
